<compile_context>
chip_gen: v7x
topology: tpu7x:2x2x1
jax: 0.10.0
libtpu: 0.0.40
codegen_flags: <defaults>
</compile_context>

<pallas_src>
import jax
import jax.numpy as jnp
import numpy as np
from jax.experimental import pallas as pl
from jax.experimental.pallas import tpu as pltpu


def _guided_filter_kernel(x_ref, y_ref, bh_ref, bw_ref, invn_ref, o_ref):
    b, h, w = x_ref.shape
    x = x_ref[...]                      # (B, H, W) f32 (kept f32 for combine)
    y = y_ref[...]                      # (B, H, W) f32
    bh = bh_ref[...]                    # (H, H) compute dtype (0/1, exact in bf16)
    bw = bw_ref[...]                    # (W, W) compute dtype
    inv_n = invn_ref[...]               # (H, W) f32, exact 1/N (precomputed)
    cdt = bh.dtype

    # W-side box sums: (B*H, W) @ (W, W) MXU matmuls (no concat copy).
    # Reshape collapsing leading dims is layout-free (last dim unchanged).
    xw = jnp.dot(x.astype(cdt).reshape(b * h, w), bw,
                 preferred_element_type=jnp.float32)           # (BH, W) f32 acc
    yw = jnp.dot(y.astype(cdt).reshape(b * h, w), bw,
                 preferred_element_type=jnp.float32)
    xw = xw.reshape(b, h, w).astype(cdt)
    yw = yw.reshape(b, h, w).astype(cdt)

    # H-side box sum + elementwise combine, per channel (plain 2D MXU matmuls,
    # short unrolled loop — robust Mosaic lowering, no batched dot_general).
    for c in range(b):
        sx = jnp.dot(bh, xw[c], preferred_element_type=jnp.float32)  # boxsum(x)
        sy = jnp.dot(bh, yw[c], preferred_element_type=jnp.float32)  # boxsum(y)
        # out = mean_A * x + mean_b = (boxsum(x) * x + boxsum(y)) * (1/N)
        o_ref[c] = ((sx * x[c] + sy) * inv_n).astype(o_ref.dtype)


def _band_matrix(n, r, dtype=jnp.float32):
    idx = jnp.arange(n)
    return (jnp.abs(idx[:, None] - idx[None, :]) <= r).astype(dtype)


def _pick_channel_block(nc, h, w, use_bf16):
    """Largest channel block that fits a ~40 MiB VMEM budget (safe on v7x)."""
    cbytes = 2 if use_bf16 else 4
    # x/y/out double-buffered (6 * 4B per pixel) + in-kernel temps (xw, yw in
    # f32 acc + cdt recast) + per-channel combine temps.
    per_chan = h * w * (6 * 4 + 2 * 4 + 2 * cbytes + 4)
    fixed = 2 * (h * h + w * w) * cbytes + 2 * h * w * 4
    budget = 40 * 1024 * 1024
    b = max(1, min(nc, (budget - fixed) // max(per_chan, 1)))
    if nc >= 2:
        b = min(b, -(-nc // 2))       # keep >= 2 grid steps (megacore)
    return int(max(1, min(b, 32)))    # cap unrolled H-side loop length


def guided_filter(x, y, r, eps=1e-8, use_bf16=True):
    n_x, c_x, h, w = x.shape
    n_y, c_y, h_y, w_y = y.shape
    assert n_x == n_y
    assert c_x == 1 or c_x == c_y
    assert h == h_y and w == w_y
    assert h > 2 * r + 1 and w > 2 * r + 1
    del eps  # unused in the "only mean" forward, matching the PyTorch module

    c = c_y
    nc = n_x * c
    # Broadcasting x (c_x == 1 case) before the per-channel boxfilter is
    # mathematically identical to PyTorch's output broadcast.
    xf = jnp.broadcast_to(x, (n_x, c, h, w)).astype(jnp.float32).reshape(nc, h, w)
    yf = jnp.asarray(y, jnp.float32).reshape(nc, h, w)

    cdt = jnp.bfloat16 if use_bf16 else jnp.float32
    bh = _band_matrix(h, r, cdt)   # 0/1 entries -> exact in bf16
    bw = _band_matrix(w, r, cdt)

    # Exact 1/N precomputed once (depends only on H, W, r).
    idx_h = jnp.arange(h)
    cnt_h = (jnp.minimum(idx_h + r, h - 1) - jnp.maximum(idx_h - r, 0) + 1
             ).astype(jnp.float32)
    idx_w = jnp.arange(w)
    cnt_w = (jnp.minimum(idx_w + r, w - 1) - jnp.maximum(idx_w - r, 0) + 1
             ).astype(jnp.float32)
    inv_n = 1.0 / (cnt_h[:, None] * cnt_w[None, :])          # (H, W) f32

    b = _pick_channel_block(nc, h, w, use_bf16)
    grid = -(-nc // b)
    nc_pad = grid * b
    if nc_pad != nc:
        pad = ((0, nc_pad - nc), (0, 0), (0, 0))
        xf = jnp.pad(xf, pad)
        yf = jnp.pad(yf, pad)

    # Explicit VMEM limit (v5e default scoped limit is only 16 MiB).
    cbytes = 2 if use_bf16 else 4
    est = (6 * b * h * w * 4 + 2 * b * h * w * (cbytes + 4)
           + (h * h + w * w) * cbytes + h * w * 4)
    vmem_limit = int(min(56 * 1024 * 1024, max(32 * 1024 * 1024, 2 * est)))

    out = pl.pallas_call(
        _guided_filter_kernel,
        out_shape=jax.ShapeDtypeStruct((nc_pad, h, w), jnp.float32),
        grid_spec=pltpu.PrefetchScalarGridSpec(
            num_scalar_prefetch=0,
            grid=(grid,),
            in_specs=[
                pl.BlockSpec((b, h, w), lambda i: (i, 0, 0)),
                pl.BlockSpec((b, h, w), lambda i: (i, 0, 0)),
                pl.BlockSpec((h, h), lambda i: (0, 0)),
                pl.BlockSpec((w, w), lambda i: (0, 0)),
                pl.BlockSpec((h, w), lambda i: (0, 0)),
            ],
            out_specs=pl.BlockSpec((b, h, w), lambda i: (i, 0, 0)),
        ),
        compiler_params=pltpu.CompilerParams(
            dimension_semantics=("parallel",),
            vmem_limit_bytes=vmem_limit),
    )(xf, yf, bh, bw, inv_n)

    return out[:nc].reshape(n_x, c, h, w)


# ----- pure-JAX reference (mirrors PyTorch cumsum-based BoxFilter) -----
def _box_ref(v, r):
    cs = jnp.cumsum(v, axis=-2)
    top = cs[..., r:2 * r + 1, :]
    mid = cs[..., 2 * r + 1:, :] - cs[..., :-2 * r - 1, :]
    bot = cs[..., -1:, :] - cs[..., -2 * r - 1:-r - 1, :]
    v = jnp.concatenate([top, mid, bot], axis=-2)
    cs = jnp.cumsum(v, axis=-1)
    left = cs[..., :, r:2 * r + 1]
    mid = cs[..., :, 2 * r + 1:] - cs[..., :, :-2 * r - 1]
    right = cs[..., :, -1:] - cs[..., :, -2 * r - 1:-r - 1]
    return jnp.concatenate([left, mid, right], axis=-1)


def _guided_filter_ref(x, y, r):
    n, _, h, w = x.shape
    ones = jnp.ones((1, 1, h, w), jnp.float32)
    N = _box_ref(ones, r)
    mean_A = _box_ref(x.astype(jnp.float32), r) / N
    mean_b = _box_ref(y.astype(jnp.float32), r) / N
    return mean_A * x + mean_b


if __name__ == "__main__":
    key = jax.random.PRNGKey(0)
    kx, ky = jax.random.split(key)
    n, c, h, w = 2, 4, 16, 16
    r = 2  # requires h, w > 2*r + 1

    x = jax.random.uniform(kx, (n, c, h, w), dtype=jnp.float32)
    y = jax.random.uniform(ky, (n, c, h, w), dtype=jnp.float32)

    ref = _guided_filter_ref(x, y, r)

    # Exact (f32 MXU) path: tight tolerance.
    out_f32 = guided_filter(x, y, r, use_bf16=False)
    jax.block_until_ready(out_f32)
    np.testing.assert_allclose(np.asarray(out_f32), np.asarray(ref),
                               rtol=1e-5, atol=1e-5)

    # Fast (bf16 MXU) path: bf16 rounding of x/y inside the box sums gives
    # ~1e-3 relative error, so the tolerance is deliberately relaxed.
    out_bf16 = guided_filter(x, y, r, use_bf16=True)
    jax.block_until_ready(out_bf16)
    np.testing.assert_allclose(np.asarray(out_bf16), np.asarray(ref),
                               rtol=1e-2, atol=1e-2)

    print("KERNEL_OK")
</pallas_src>

<mosaic_0001>
module attributes {stable_mosaic.version = 11 : i64} {
  func.func @_guided_filter_kernel(%arg0: i32, %arg1: memref<4x16x16xf32, #tpu.memory_space<vmem>>, %arg2: memref<4x16x16xf32, #tpu.memory_space<vmem>>, %arg3: memref<16x16xf32, #tpu.memory_space<vmem>>, %arg4: memref<16x16xf32, #tpu.memory_space<vmem>>, %arg5: memref<16x16xf32, #tpu.memory_space<vmem>>, %arg6: memref<4x16x16xf32, #tpu.memory_space<vmem>>) attributes {dimension_semantics = [#tpu.dimension_semantics<parallel>], iteration_bounds = array<i64: 2>, scalar_prefetch = 0 : i64, scratch_operands = 0 : i64, tpu.core_type = #tpu.core_type<tc>, window_params = [{transform_indices = @transform_0, window_bounds = array<i64: 4, 16, 16>}, {transform_indices = @transform_1, window_bounds = array<i64: 4, 16, 16>}, {pipeline_mode = #tpu.pipeline_mode<synchronous>, transform_indices = @transform_2, window_bounds = array<i64: 16, 16>}, {pipeline_mode = #tpu.pipeline_mode<synchronous>, transform_indices = @transform_3, window_bounds = array<i64: 16, 16>}, {pipeline_mode = #tpu.pipeline_mode<synchronous>, transform_indices = @transform_4, window_bounds = array<i64: 16, 16>}, {transform_indices = @transform_5, window_bounds = array<i64: 4, 16, 16>}]} {
    %c0 = arith.constant 0 : index
    %c0_0 = arith.constant 0 : index
    %c0_1 = arith.constant 0 : index
    %0 = vector.load %arg1[%c0, %c0_0, %c0_1] : memref<4x16x16xf32, #tpu.memory_space<vmem>>, vector<4x16x16xf32>
    %c0_2 = arith.constant 0 : index
    %c0_3 = arith.constant 0 : index
    %c0_4 = arith.constant 0 : index
    %1 = vector.load %arg2[%c0_2, %c0_3, %c0_4] : memref<4x16x16xf32, #tpu.memory_space<vmem>>, vector<4x16x16xf32>
    %c0_5 = arith.constant 0 : index
    %c0_6 = arith.constant 0 : index
    %2 = vector.load %arg3[%c0_5, %c0_6] : memref<16x16xf32, #tpu.memory_space<vmem>>, vector<16x16xf32>
    %c0_7 = arith.constant 0 : index
    %c0_8 = arith.constant 0 : index
    %3 = vector.load %arg4[%c0_7, %c0_8] : memref<16x16xf32, #tpu.memory_space<vmem>>, vector<16x16xf32>
    %c0_9 = arith.constant 0 : index
    %c0_10 = arith.constant 0 : index
    %4 = vector.load %arg5[%c0_9, %c0_10] : memref<16x16xf32, #tpu.memory_space<vmem>>, vector<16x16xf32>
    %5 = vector.shape_cast %0 : vector<4x16x16xf32> to vector<64x16xf32>
    %cst = arith.constant dense<0.000000e+00> : vector<64x16xf32>
    %6 = tpu.matmul %5, %3, %cst {dimension_numbers = #tpu.dot_dimension_numbers<[1], [0], [0], [1], [0, 0, 1, 1], [], []>} : vector<64x16xf32>, vector<16x16xf32>, vector<64x16xf32> -> vector<64x16xf32>
    %7 = vector.shape_cast %1 : vector<4x16x16xf32> to vector<64x16xf32>
    %cst_11 = arith.constant dense<0.000000e+00> : vector<64x16xf32>
    %8 = tpu.matmul %7, %3, %cst_11 {dimension_numbers = #tpu.dot_dimension_numbers<[1], [0], [0], [1], [0, 0, 1, 1], [], []>} : vector<64x16xf32>, vector<16x16xf32>, vector<64x16xf32> -> vector<64x16xf32>
    %9 = vector.shape_cast %6 : vector<64x16xf32> to vector<4x16x16xf32>
    %10 = vector.shape_cast %8 : vector<64x16xf32> to vector<4x16x16xf32>
    %11 = vector.extract_strided_slice %9 {offsets = [0, 0, 0], sizes = [1, 16, 16], strides = [1, 1, 1]} : vector<4x16x16xf32> to vector<1x16x16xf32>
    %12 = vector.shape_cast %11 : vector<1x16x16xf32> to vector<16x16xf32>
    %cst_12 = arith.constant dense<0.000000e+00> : vector<16x16xf32>
    %13 = tpu.matmul %2, %12, %cst_12 {dimension_numbers = #tpu.dot_dimension_numbers<[1], [0], [0], [1], [0, 0, 1, 1], [], []>} : vector<16x16xf32>, vector<16x16xf32>, vector<16x16xf32> -> vector<16x16xf32>
    %14 = vector.extract_strided_slice %10 {offsets = [0, 0, 0], sizes = [1, 16, 16], strides = [1, 1, 1]} : vector<4x16x16xf32> to vector<1x16x16xf32>
    %15 = vector.shape_cast %14 : vector<1x16x16xf32> to vector<16x16xf32>
    %cst_13 = arith.constant dense<0.000000e+00> : vector<16x16xf32>
    %16 = tpu.matmul %2, %15, %cst_13 {dimension_numbers = #tpu.dot_dimension_numbers<[1], [0], [0], [1], [0, 0, 1, 1], [], []>} : vector<16x16xf32>, vector<16x16xf32>, vector<16x16xf32> -> vector<16x16xf32>
    %17 = vector.extract_strided_slice %0 {offsets = [0, 0, 0], sizes = [1, 16, 16], strides = [1, 1, 1]} : vector<4x16x16xf32> to vector<1x16x16xf32>
    %18 = vector.shape_cast %17 : vector<1x16x16xf32> to vector<16x16xf32>
    %19 = arith.mulf %13, %18 : vector<16x16xf32>
    %20 = arith.addf %19, %16 : vector<16x16xf32>
    %21 = arith.mulf %20, %4 : vector<16x16xf32>
    %c0_14 = arith.constant 0 : index
    %c0_15 = arith.constant 0 : index
    %c0_16 = arith.constant 0 : index
    %22 = vector.load %arg6[%c0_14, %c0_15, %c0_16] : memref<4x16x16xf32, #tpu.memory_space<vmem>>, vector<1x16x16xf32>
    %23 = vector.shape_cast %22 : vector<1x16x16xf32> to vector<16x16xf32>
    %24 = vector.shape_cast %21 : vector<16x16xf32> to vector<1x16x16xf32>
    tpu.vector_store %arg6[%c0_14, %c0_15, %c0_16], %24 {strides = array<i32>} : memref<4x16x16xf32, #tpu.memory_space<vmem>>, vector<1x16x16xf32>,
    %25 = vector.extract_strided_slice %9 {offsets = [1, 0, 0], sizes = [1, 16, 16], strides = [1, 1, 1]} : vector<4x16x16xf32> to vector<1x16x16xf32>
    %26 = vector.shape_cast %25 : vector<1x16x16xf32> to vector<16x16xf32>
    %cst_17 = arith.constant dense<0.000000e+00> : vector<16x16xf32>
    %27 = tpu.matmul %2, %26, %cst_17 {dimension_numbers = #tpu.dot_dimension_numbers<[1], [0], [0], [1], [0, 0, 1, 1], [], []>} : vector<16x16xf32>, vector<16x16xf32>, vector<16x16xf32> -> vector<16x16xf32>
    %28 = vector.extract_strided_slice %10 {offsets = [1, 0, 0], sizes = [1, 16, 16], strides = [1, 1, 1]} : vector<4x16x16xf32> to vector<1x16x16xf32>
    %29 = vector.shape_cast %28 : vector<1x16x16xf32> to vector<16x16xf32>
    %cst_18 = arith.constant dense<0.000000e+00> : vector<16x16xf32>
    %30 = tpu.matmul %2, %29, %cst_18 {dimension_numbers = #tpu.dot_dimension_numbers<[1], [0], [0], [1], [0, 0, 1, 1], [], []>} : vector<16x16xf32>, vector<16x16xf32>, vector<16x16xf32> -> vector<16x16xf32>
    %31 = vector.extract_strided_slice %0 {offsets = [1, 0, 0], sizes = [1, 16, 16], strides = [1, 1, 1]} : vector<4x16x16xf32> to vector<1x16x16xf32>
    %32 = vector.shape_cast %31 : vector<1x16x16xf32> to vector<16x16xf32>
    %33 = arith.mulf %27, %32 : vector<16x16xf32>
    %34 = arith.addf %33, %30 : vector<16x16xf32>
    %35 = arith.mulf %34, %4 : vector<16x16xf32>
    %c1 = arith.constant 1 : index
    %c0_19 = arith.constant 0 : index
    %c0_20 = arith.constant 0 : index
    %36 = vector.load %arg6[%c1, %c0_19, %c0_20] : memref<4x16x16xf32, #tpu.memory_space<vmem>>, vector<1x16x16xf32>
    %37 = vector.shape_cast %36 : vector<1x16x16xf32> to vector<16x16xf32>
    %38 = vector.shape_cast %35 : vector<16x16xf32> to vector<1x16x16xf32>
    tpu.vector_store %arg6[%c1, %c0_19, %c0_20], %38 {strides = array<i32>} : memref<4x16x16xf32, #tpu.memory_space<vmem>>, vector<1x16x16xf32>,
    %39 = vector.extract_strided_slice %9 {offsets = [2, 0, 0], sizes = [1, 16, 16], strides = [1, 1, 1]} : vector<4x16x16xf32> to vector<1x16x16xf32>
    %40 = vector.shape_cast %39 : vector<1x16x16xf32> to vector<16x16xf32>
    %cst_21 = arith.constant dense<0.000000e+00> : vector<16x16xf32>
    %41 = tpu.matmul %2, %40, %cst_21 {dimension_numbers = #tpu.dot_dimension_numbers<[1], [0], [0], [1], [0, 0, 1, 1], [], []>} : vector<16x16xf32>, vector<16x16xf32>, vector<16x16xf32> -> vector<16x16xf32>
    %42 = vector.extract_strided_slice %10 {offsets = [2, 0, 0], sizes = [1, 16, 16], strides = [1, 1, 1]} : vector<4x16x16xf32> to vector<1x16x16xf32>
    %43 = vector.shape_cast %42 : vector<1x16x16xf32> to vector<16x16xf32>
    %cst_22 = arith.constant dense<0.000000e+00> : vector<16x16xf32>
    %44 = tpu.matmul %2, %43, %cst_22 {dimension_numbers = #tpu.dot_dimension_numbers<[1], [0], [0], [1], [0, 0, 1, 1], [], []>} : vector<16x16xf32>, vector<16x16xf32>, vector<16x16xf32> -> vector<16x16xf32>
    %45 = vector.extract_strided_slice %0 {offsets = [2, 0, 0], sizes = [1, 16, 16], strides = [1, 1, 1]} : vector<4x16x16xf32> to vector<1x16x16xf32>
    %46 = vector.shape_cast %45 : vector<1x16x16xf32> to vector<16x16xf32>
    %47 = arith.mulf %41, %46 : vector<16x16xf32>
    %48 = arith.addf %47, %44 : vector<16x16xf32>
    %49 = arith.mulf %48, %4 : vector<16x16xf32>
    %c2 = arith.constant 2 : index
    %c0_23 = arith.constant 0 : index
    %c0_24 = arith.constant 0 : index
    %50 = vector.load %arg6[%c2, %c0_23, %c0_24] : memref<4x16x16xf32, #tpu.memory_space<vmem>>, vector<1x16x16xf32>
    %51 = vector.shape_cast %50 : vector<1x16x16xf32> to vector<16x16xf32>
    %52 = vector.shape_cast %49 : vector<16x16xf32> to vector<1x16x16xf32>
    tpu.vector_store %arg6[%c2, %c0_23, %c0_24], %52 {strides = array<i32>} : memref<4x16x16xf32, #tpu.memory_space<vmem>>, vector<1x16x16xf32>,
    %53 = vector.extract_strided_slice %9 {offsets = [3, 0, 0], sizes = [1, 16, 16], strides = [1, 1, 1]} : vector<4x16x16xf32> to vector<1x16x16xf32>
    %54 = vector.shape_cast %53 : vector<1x16x16xf32> to vector<16x16xf32>
    %cst_25 = arith.constant dense<0.000000e+00> : vector<16x16xf32>
    %55 = tpu.matmul %2, %54, %cst_25 {dimension_numbers = #tpu.dot_dimension_numbers<[1], [0], [0], [1], [0, 0, 1, 1], [], []>} : vector<16x16xf32>, vector<16x16xf32>, vector<16x16xf32> -> vector<16x16xf32>
    %56 = vector.extract_strided_slice %10 {offsets = [3, 0, 0], sizes = [1, 16, 16], strides = [1, 1, 1]} : vector<4x16x16xf32> to vector<1x16x16xf32>
    %57 = vector.shape_cast %56 : vector<1x16x16xf32> to vector<16x16xf32>
    %cst_26 = arith.constant dense<0.000000e+00> : vector<16x16xf32>
    %58 = tpu.matmul %2, %57, %cst_26 {dimension_numbers = #tpu.dot_dimension_numbers<[1], [0], [0], [1], [0, 0, 1, 1], [], []>} : vector<16x16xf32>, vector<16x16xf32>, vector<16x16xf32> -> vector<16x16xf32>
    %59 = vector.extract_strided_slice %0 {offsets = [3, 0, 0], sizes = [1, 16, 16], strides = [1, 1, 1]} : vector<4x16x16xf32> to vector<1x16x16xf32>
    %60 = vector.shape_cast %59 : vector<1x16x16xf32> to vector<16x16xf32>
    %61 = arith.mulf %55, %60 : vector<16x16xf32>
    %62 = arith.addf %61, %58 : vector<16x16xf32>
    %63 = arith.mulf %62, %4 : vector<16x16xf32>
    %c3 = arith.constant 3 : index
    %c0_27 = arith.constant 0 : index
    %c0_28 = arith.constant 0 : index
    %64 = vector.load %arg6[%c3, %c0_27, %c0_28] : memref<4x16x16xf32, #tpu.memory_space<vmem>>, vector<1x16x16xf32>
    %65 = vector.shape_cast %64 : vector<1x16x16xf32> to vector<16x16xf32>
    %66 = vector.shape_cast %63 : vector<16x16xf32> to vector<1x16x16xf32>
    tpu.vector_store %arg6[%c3, %c0_27, %c0_28], %66 {strides = array<i32>} : memref<4x16x16xf32, #tpu.memory_space<vmem>>, vector<1x16x16xf32>,
    return
  }
  func.func @transform_0(%arg0: i32) -> (i32, i32, i32) {
    %c0_i32 = arith.constant 0 : i32
    %c0_i32_0 = arith.constant 0 : i32
    %c0_i32_1 = arith.constant 0 : i32
    return %arg0, %c0_i32, %c0_i32_0 : i32, i32, i32
  }
  func.func @transform_1(%arg0: i32) -> (i32, i32, i32) {
    %c0_i32 = arith.constant 0 : i32
    %c0_i32_0 = arith.constant 0 : i32
    %c0_i32_1 = arith.constant 0 : i32
    return %arg0, %c0_i32, %c0_i32_0 : i32, i32, i32
  }
  func.func @transform_2(%arg0: i32) -> (i32, i32) {
    %c0_i32 = arith.constant 0 : i32
    %c0_i32_0 = arith.constant 0 : i32
    %c0_i32_1 = arith.constant 0 : i32
    return %c0_i32, %c0_i32_0 : i32, i32
  }
  func.func @transform_3(%arg0: i32) -> (i32, i32) {
    %c0_i32 = arith.constant 0 : i32
    %c0_i32_0 = arith.constant 0 : i32
    %c0_i32_1 = arith.constant 0 : i32
    return %c0_i32, %c0_i32_0 : i32, i32
  }
  func.func @transform_4(%arg0: i32) -> (i32, i32) {
    %c0_i32 = arith.constant 0 : i32
    %c0_i32_0 = arith.constant 0 : i32
    %c0_i32_1 = arith.constant 0 : i32
    return %c0_i32, %c0_i32_0 : i32, i32
  }
  func.func @transform_5(%arg0: i32) -> (i32, i32, i32) {
    %c0_i32 = arith.constant 0 : i32
    %c0_i32_0 = arith.constant 0 : i32
    %c0_i32_1 = arith.constant 0 : i32
    return %arg0, %c0_i32, %c0_i32_0 : i32, i32, i32
  }
}

</mosaic_0001>

<bundles_post_ra>
// kernel: tpu_custom_call.1
= control target key start
LH: loop header
LB: loop body
LE: loop exit
PB: predicated region body
PF: predicated region fallthrough
CT: control target
= control target key end

     0   :  { %s2418_s0 = inlined_call_operand.hbm [shape: f32[8,16,16], index: 0, kind: input, shape index: {}]   ;;  %s2419_s1 = inlined_call_operand.hbm [shape: f32[8,16,16], index: 1, kind: input, shape index: {}]   ;;  %s2420_s2 = inlined_call_operand.hbm [shape: f32[16,16], index: 2, kind: input, shape index: {}]   ;;  %s2421_s3 = inlined_call_operand.hbm [shape: f32[16,16], index: 3, kind: input, shape index: {}]   ;;  %s2422_s4 = inlined_call_operand.hbm [shape: f32[16,16], index: 4, kind: input, shape index: {}]   ;;  %s2423_s5 = inlined_call_operand.hbm [shape: f32[8,16,16], index: 5, kind: output, shape index: {}]  }
   0x1   :  { %2431 = sst [smem:[#allocation17_spill]] %s2418_s0 }
   0x2   :  { %2432 = sst [smem:[#allocation18_spill]] %s2420_s2 }
   0x3   :  { %2433 = sst [smem:[#allocation19_spill]] %s2421_s3 }
   0x4   :  { %2434 = sst [smem:[#allocation20_spill]] %s2422_s4 }
   0x5   :  { %10 = vsyncpa [#allocation3], 0 }
   0x6   :  { %12 = vsyncpa [#allocation3 + $0x1], 0 }
   0x7   :  { %13 = vsyncpa [#allocation6], 0 }
   0x8   :  { %15 = vsyncpa [#allocation6 + $0x1], 0 }
   0x9   :  { %16 = vsyncpa [#allocation9], 0 }
   0xa   :  { %17 = vsyncpa [#allocation4], 0 }
   0xb   :  { %19 = vsyncpa [#allocation4 + $0x1], 0  ;;  %s1993_s18 = smov 0   ;;  %s1995_s19 = smov 0  }
   0xc   :  { %s1997_s20 = smov 0   ;;  %s1999_s21 = smov 0  }
   0xd LB: > { %s2014_s22 = sadd.s32 4294967295, %s1951_s21   ;;  %s1392_s23 = sadd.s32 4294967294, %s1951_s21   ;;  %s1951_s21 = sphi %s1999_s21, %s2460_s21   ;;  %s1947_s20 = sphi %s1997_s20, %s2459_s20   ;;  %s1943_s19 = sphi %s1995_s19, %s2458_s19   ;;  %s1939_s18 = sphi %s1993_s18, %s2457_s18  }
   0xe   : > { %p45_p0 = scmp.ne.s32.totalorder %s1943_s19, %s1939_s18  ;;  %p2424_p1 = scmp.eq.s32.totalorder %s2014_s22, 0 }
   0xf   : > { %p164_p3 = scmp.eq.s32.totalorder %s1392_s23, 1  ;;  %p1393_p5 = scmp.ge.s32.totalorder %s1951_s21, 1 }
  0x10   : > { %p2023_p4 = por %p2424_p1, %p45_p0  ;;  %p171_p7 = scmp.lt.s32.totalorder %s1951_s21, 3 }
  0x11   : > { %p2028_p6 = por %p164_p3, %p45_p0  ;;  %s1953_s27 = smov [#allocation7]  }
  0x12   : > { %s2435_s24 = scalar_select %p2023_p4, 1, 0 }
  0x13   : > { %s2436_s25 = scalar_select %p2028_p6, 1, 0 }
  0x14   : > { %p2033_p8 = pnand %p1393_p5, %p171_p7  ;;  %s183_s28 = sshll.u32 %s1953_s27, 4  ;;  %s2037_s28 = int_to_ptr.vmem [resolvable:$true] %s183_s28 }
  0x15   : > { %s1954_s30 = smov [#allocation8]   ;;  %s1955_s7 = smov [#allocation10]  }
  0x16   : > { %s2437_s26 = scalar_select %p2033_p8, 1, 0 }
  0x17   : > { %p1661_p9 = pneg %p2033_p8  ;;  %s196_s6 = sshll.u32 %s1954_s30, 4  ;;  %s2048_s6 = int_to_ptr.vmem [resolvable:$true] %s196_s6 }
  0x18   : > { %s2050_s8 = sshll.u32 %s1955_s7, 4  ;;  %s2439_s2 = sld [smem:[#allocation18_spill]]  ;;  %s210_s8 = int_to_ptr.vmem [resolvable:$true] %s2050_s8 }
  0x19   : > { %p2044_p11 = pnand %p1661_p9, %p2424_p1 }
  0x1b   : > { %p2060_p13 = pneg %p2044_p11 }
  0x1e   : > { %s1729_s11 = scalar_lea.hbm %s2439_s2, 256 }
  0x1f   : > { %p1730_p12 = scmp.ne.s32.totalorder %s2439_s2, %s1729_s11  ;;  %p1736_p5 = scmp.lt.u32.totalorder %s1729_s11, %s2439_s2 }
  0x21   : > { %p1732_p0 = pnand %p2060_p13, %p1730_p12 }
  0x23   : > { %p1733_p3 = pneg %p1732_p0 }
  0x25   : > { %p1738_p7 = pnand %p1736_p5, %p1733_p3 }
  0x27   : > { %1741 = shalt.err (!%p1738_p7)
}
  0x28   : > { %s1742_s17 = scalar_lea.vmem %s2037_s28, 256  ;;  %p1750_p2 = scmp.lt.s32.totalorder %s2037_s28, %s2037_s28 }
  0x29   : > { %p1743_p9 = scmp.ne.s32.totalorder %s2037_s28, %s1742_s17  ;;  %p1751_p6 = scmp.lt.s32.totalorder %s1742_s17, %s1742_s17 }
  0x2b   : > { %p1745_p10 = pnand %p1743_p9, %p2060_p13  ;;  %p1752_p12 = por %p1751_p6, %p1750_p2 }
  0x2d   : > { %p1746_p1 = pneg %p1745_p10 }
  0x2f   : > { %p1753_p0 = pnand %p1752_p12, %p1746_p1 }
  0x31   : > { %1756 = shalt.err (!%p1753_p0)
}
  0x32   : > { %s2427_s23 = smov 128   ;;  %s2429_s27 = smov 8  }
  0x33   : > { %1664 = dma.hbm_to_vmem [thread:$0]  (!%p2044_p11), %s2439_s2, 256, %s2037_s28, [#allocation6], %s2427_s23, %s2427_s23, %s2429_s27  }
  0x34   : > { %s2441_s3 = sld [smem:[#allocation19_spill]] }
  0x3a   : > { %s1757_s11 = scalar_lea.hbm %s2441_s3, 256 }
  0x3b   : > { %p1758_p1 = scmp.ne.s32.totalorder %s2441_s3, %s1757_s11  ;;  %p1764_p10 = scmp.lt.u32.totalorder %s1757_s11, %s2441_s3 }
  0x3d   : > { %p1760_p2 = pnand %p1758_p1, %p2060_p13 }
  0x3f   : > { %p1761_p6 = pneg %p1760_p2 }
  0x41   : > { %p1766_p3 = pnand %p1764_p10, %p1761_p6 }
  0x43   : > { %1769 = shalt.err (!%p1766_p3)
}
  0x44   : > { %s1770_s28 = scalar_lea.vmem %s2048_s6, 256  ;;  %p1778_p12 = scmp.lt.s32.totalorder %s2048_s6, %s2048_s6 }
  0x45   : > { %p1771_p5 = scmp.ne.s32.totalorder %s2048_s6, %s1770_s28  ;;  %p1779_p0 = scmp.lt.s32.totalorder %s1770_s28, %s1770_s28 }
  0x47   : > { %p1773_p7 = pnand %p1771_p5, %p2060_p13  ;;  %p1780_p1 = por %p1779_p0, %p1778_p12 }
  0x49   : > { %p1774_p9 = pneg %p1773_p7 }
  0x4b   : > { %p1781_p2 = pnand %p1780_p1, %p1774_p9 }
  0x4d   : > { %1784 = shalt.err (!%p1781_p2)
}
  0x4e   : > { %1667 = dma.hbm_to_vmem [thread:$0]  (!%p2044_p11), %s2441_s3, 256, %s2048_s6, [#allocation9], %s2427_s23, %s2427_s23, %s2429_s27  }
  0x4f   : > { %s2442_s4 = sld [smem:[#allocation20_spill]] }
  0x55   : > { %s1785_s10 = scalar_lea.hbm %s2442_s4, 256 }
  0x56   : > { %p1786_p6 = scmp.ne.s32.totalorder %s2442_s4, %s1785_s10  ;;  %p1792_p5 = scmp.lt.u32.totalorder %s1785_s10, %s2442_s4 }
  0x58   : > { %p1788_p10 = pnand %p1786_p6, %p2060_p13 }
  0x5a   : > { %p1789_p3 = pneg %p1788_p10 }
  0x5c   : > { %p1794_p7 = pnand %p1792_p5, %p1789_p3 }
  0x5e   : > { %1797 = shalt.err (!%p1794_p7)
}
  0x5f   : > { %s1798_s16 = scalar_lea.vmem %s210_s8, 256  ;;  %p1806_p1 = scmp.lt.s32.totalorder %s210_s8, %s210_s8 }
  0x60   : > { %p1799_p9 = scmp.ne.s32.totalorder %s210_s8, %s1798_s16  ;;  %p1807_p2 = scmp.lt.s32.totalorder %s1798_s16, %s1798_s16 }
  0x62   : > { %p1801_p12 = pnand %p1799_p9, %p2060_p13  ;;  %p1808_p4 = por %p1807_p2, %p1806_p1 }
  0x64   : > { %p1802_p0 = pneg %p1801_p12 }
  0x66   : > { %p1809_p8 = pnand %p1808_p4, %p1802_p0 }
  0x68   : > { %1812 = shalt.err (!%p1809_p8)
}
  0x69   : > { %1670 = dma.hbm_to_vmem [thread:$0]  (!%p2044_p11), %s2442_s4, 256, %s210_s8, [#allocation9], %s2427_s23, %s2427_s23, %s2429_s27  }
  0x6a   : > { %s2133_s14 = sadd.s32 1, %s1951_s21   ;;  %s32_s17 = sadd.s32 1, %s1947_s20 }
  0x6b   : > { %s29_s29 = ssub.s32 %s1951_s21, %s2133_s14  ;;  %p39_p8 = scmp.ne.s32.totalorder %s1947_s20, %s1943_s19 }
  0x6c   : > { %p30_p4 = scmp.eq.s32.totalorder %s29_s29, 0  ;;  %p40_p13 = scmp.eq.s32.totalorder %s1951_s21, 0 }
  0x6d   : > { %p1685_p6 = scmp.lt.s32.totalorder %s1951_s21, 2  ;;  %p2443_p3 = scmp.eq.s32.totalorder %s2014_s22, 1 }
  0x6e   : > { %s2143_s30 = scalar_select %p30_p4, %s1947_s20, %s32_s17  }
  0x6f   : > { %p41_p10 = por %p40_p13, %p39_p8  ;;  %p2147_p5 = por %p2443_p3, %p39_p8 }
  0x70   : > { %s223_s9 = sand.u32 1, %s1947_s20   ;;  %s1458_s10 = sshll.u32 %s1951_s21, 10 }
  0x71   : > { %s2153_s8 = sshll.u32 %s223_s9, 6  ;;  %s2445_s0 = sld [smem:[#allocation17_spill]] }
  0x72   : > { %s227_s15 = scalar_lea.vmem [#allocation2], %s2153_s8  ;;  %p2161_p11 = pnand %p1685_p6, %p41_p10 }
  0x73   : > { %s235_s16 = sshll.u32 %s227_s15, 4  ;;  %s2170_s17 = scalar_lea.hbm %s2419_s1, %s1458_s10  ;;  %s2165_s16 = int_to_ptr.vmem [resolvable:$true] %s235_s16 }
  0x74   : > { %s2172_s11 = scalar_lea.sflag [#allocation3], %s223_s9  ;;  %p1815_p9 = pneg %p2161_p11 }
  0x77   : > { %s2158_s13 = scalar_lea.hbm %s2445_s0, %s1458_s10  ;;  %s1818_s27 = scalar_lea.hbm %s2445_s0, 2048 }
  0x78   : > { %s1813_s12 = scalar_lea.hbm %s2158_s13, 1024  ;;  %p1819_p1 = scmp.lt.u32.totalorder %s2158_s13, %s2445_s0 }
  0x79   : > { %p1814_p7 = scmp.ne.s32.totalorder %s2158_s13, %s1813_s12  ;;  %p1820_p2 = scmp.lt.u32.totalorder %s1818_s27, %s1813_s12 }
  0x7a   : > { %p1822_p8 = scmp.lt.u32.totalorder %s1813_s12, %s2158_s13 }
  0x7b   : > { %p1816_p12 = pnand %p1815_p9, %p1814_p7  ;;  %p1821_p4 = por %p1820_p2, %p1819_p1 }
  0x7d   : > { %p1817_p0 = pneg %p1816_p12  ;;  %p1823_p13 = por %p1822_p8, %p1821_p4 }
  0x7f   : > { %p1824_p6 = pnand %p1823_p13, %p1817_p0 }
  0x81   : > { %1827 = shalt.err (!%p1824_p6)
}
  0x82   : > { %s1828_s9 = scalar_lea.vmem %s2165_s16, 1024  ;;  %s1958_s23 = smov [#allocation2]  }
  0x83   : > { %p1829_p10 = scmp.ne.s32.totalorder %s2165_s16, %s1828_s9  ;;  %s1833_s10 = sshll.u32 %s1958_s23, 4  ;;  %s1834_s10 = int_to_ptr.vmem [resolvable:$false] %s1833_s10 }
  0x84   : > { %s1835_s2 = scalar_lea.vmem %s1834_s10, 2048  ;;  %p1836_p12 = scmp.lt.s32.totalorder %s2165_s16, %s1834_s10 }
  0x85   : > { %p1831_p3 = pnand %p1829_p10, %p1815_p9  ;;  %p1837_p1 = scmp.lt.s32.totalorder %s1835_s2, %s1828_s9 }
  0x87   : > { %p1832_p7 = pneg %p1831_p3  ;;  %p1838_p2 = por %p1837_p1, %p1836_p12 }
  0x89   : > { %p1839_p4 = pnand %p1838_p2, %p1832_p7 }
  0x8b   : > { %1842 = shalt.err (!%p1839_p4)
}
  0x8c   : > { %s2447_s3 = smov 8   ;;  %s2448_s27 = smov 128  }
  0x8d   : > { %1674 = dma.hbm_to_vmem [thread:$0]  (!%p2161_p11), %s2158_s13, 1024, %s2165_s16, %s2172_s11, %s2448_s27, %s2448_s27, %s2447_s3  }
  0x8e   : > { %s249_s28 = scalar_lea.vmem [#allocation5], %s2153_s8  ;;  %s245_s12 = sand.u32 1, %s1951_s21  }
  0x8f   : > { %s257_s29 = sshll.u32 %s249_s28, 4  ;;  %s2207_s15 = scalar_lea.sflag [#allocation6], %s245_s12  ;;  %s2205_s29 = int_to_ptr.vmem [resolvable:$true] %s257_s29 }
  0x90   : > { %s1843_s9 = scalar_lea.hbm %s2170_s17, 1024  ;;  %s1848_s2 = scalar_lea.hbm %s2419_s1, 2048 }
  0x91   : > { %p1844_p0 = scmp.ne.s32.totalorder %s2170_s17, %s1843_s9  ;;  %p1849_p6 = scmp.lt.u32.totalorder %s2170_s17, %s2419_s1 }
  0x92   : > { %p1850_p10 = scmp.lt.u32.totalorder %s1848_s2, %s1843_s9  ;;  %p1852_p7 = scmp.lt.u32.totalorder %s1843_s9, %s2170_s17 }
  0x93   : > { %p1846_p8 = pnand %p1844_p0, %p1815_p9 }
  0x94   : > { %p1851_p3 = por %p1850_p10, %p1849_p6 }
  0x95   : > { %p1847_p13 = pneg %p1846_p8 }
  0x96   : > { %p1853_p12 = por %p1852_p7, %p1851_p3 }
  0x98   : > { %p1854_p1 = pnand %p1853_p12, %p1847_p13 }
  0x9a   : > { %1857 = shalt.err (!%p1854_p1)
}
  0x9b   : > { %s1858_s8 = scalar_lea.vmem %s2205_s29, 1024  ;;  %s1959_s13 = smov [#allocation5]  }
  0x9c   : > { %p1859_p2 = scmp.ne.s32.totalorder %s2205_s29, %s1858_s8  ;;  %s1863_s16 = sshll.u32 %s1959_s13, 4  ;;  %s1864_s16 = int_to_ptr.vmem [resolvable:$false] %s1863_s16 }
  0x9d   : > { %s1865_s0 = scalar_lea.vmem %s1864_s16, 2048  ;;  %p1866_p8 = scmp.lt.s32.totalorder %s2205_s29, %s1864_s16 }
  0x9e   : > { %p1861_p4 = pnand %p1859_p2, %p1815_p9  ;;  %p1867_p6 = scmp.lt.s32.totalorder %s1865_s0, %s1858_s8 }
  0xa0   : > { %p1862_p0 = pneg %p1861_p4  ;;  %p1868_p10 = por %p1867_p6, %p1866_p8 }
  0xa2   : > { %p1869_p3 = pnand %p1868_p10, %p1862_p0 }
  0xa4   : > { %1872 = shalt.err (!%p1869_p3)
}
  0xa5   : > { %1677 = dma.hbm_to_vmem [thread:$0]  (!%p2161_p11), %s2170_s17, 1024, %s2205_s29, %s2207_s15, %s2448_s27, %s2448_s27, %s2447_s3  }
  0xa6   : > { %p2449_p9 = scmp.ne.s32.totalorder %s2437_s26, 0 }
  0xa7   : > { %s2239_s4 = sand.u32 (!%p2449_p9), 1, %s1943_s19   ;;  %p2450_p13 = scmp.ne.s32.totalorder (!%p2449_p9), %s2435_s24, 0 }
  0xa8   : > { %269 = sbr.rel (%p2449_p9) target bundleno = 658 (0x292), region = 40  ;;  %s2242_s11 = sshll.u32 (!%p2449_p9), %s2239_s4, 6 }
  0xa9   : > { %s272_s6 = scalar_lea.sflag (!%p2449_p9), [#allocation3], %s2239_s4  ;;  %s2246_s28 = scalar_lea.vmem (!%p2449_p9), [#allocation2], %s2242_s11 }
  0xaf   : > { %1918 = dma.done.wait (%p2450_p13), %s272_s6, 1024  }
  0xb0   : > { %1920 = vsyncadd (%p2450_p13), %s272_s6, 4294966272  ;;  %s280_s26 = sand.u32 1, %s2014_s22   ;;  %s2254_s3 = scalar_lea.vmem [#allocation5], %s2242_s11 }
  0xb1   : > { %s281_s17 = scalar_lea.sflag [#allocation6], %s280_s26 }
  0xb2   : > { %1922 = dma.done.wait (%p2450_p13), %s281_s17, 1024  }
  0xb3   : > { %1924 = vsyncadd (%p2450_p13), %s281_s17, 4294966272  ;;  %p2451_p11 = scmp.eq.s32.totalorder %s2014_s22, 0 }
  0xb5   : > { %1926 = dma.done.wait (%p2451_p11), [#allocation6], 256   ;;  %p2452_p7 = pmov %p2451_p11 }
  0xb7   : > { %1928 = vsyncadd (%p2452_p7), [#allocation6], 4294967040  ;;  %p2453_p12 = pmov %p2452_p7 }
  0xb8   : > { %p2454_p1 = pmov %p2452_p7 }
  0xb9   : > { %1930 = dma.done.wait (%p2453_p12), [#allocation9], 512  }
  0xba   : > { %1932 = vsyncadd (%p2454_p1), [#allocation9], 4294966784  ;;  %vm353_vm0 = vcmask 130048   ;;  %v349_v0 = vld [vmem:[#allocation8] sm:$0xff]  ;;  %v350_v1 = vld [vmem:[#allocation8 + $0x8] sm:$0xff]  ;;  %s2345_s24 = scalar_lea.vmem [#allocation11], %s2242_s11 }
  0xbb   : > { %v2269_v2 = vld [vmem:[%s2246_s28] sm:$0xff]  ;;  %v1603_v3 = vpack.c.bf16 %v350_v1, %v349_v0  ;;  %v2276_v5 = vld [vmem:[%s2246_s28 + $0x8] sm:$0xff]  ;;  %v2280_v7 = vld [vmem:[%s2246_s28 + $0x10] sm:$0xff]  ;;  %s1462_s27 = sshll.u32 %s2014_s22, 10  ;;  %s1268_s29 = sshll.u32 %s2345_s24, 4  ;;  %s2370_s29 = int_to_ptr.vmem [resolvable:$true] %s1268_s29 }
  0xbc   : > { %1519 = vmatprep.mubr.msk.f32.mxu0 %vm353_vm0, %v2269_v2  ;;  %v339_v4 = vld [vmem:[%s2254_s3] sm:$0xff]  ;;  %v340_v6 = vld [vmem:[%s2254_s3 + $0x8] sm:$0xff]  ;;  %v341_v8 = vld [vmem:[%s2254_s3 + $0x10] sm:$0xff]  ;;  %s2368_s9 = scalar_lea.hbm %s2423_s5, %s1462_s27  ;;  %s1254_s22 = scalar_lea.sflag [#allocation4], %s2239_s4 }
  0xbd   : > { %1535 = vmatprep.mubr.msk.f32.mxu1 %vm353_vm0, %v339_v4  ;;  %1604 = vmatprep.subr.bf16.mxu0 %v1603_v3  ;;  %v2289_v9 = vld [vmem:[%s2246_s28 + $0x18] sm:$0xff]  ;;  %v2294_v11 = vld [vmem:[%s2246_s28 + $0x20] sm:$0xff]  ;;  %v2303_v13 = vld [vmem:[%s2246_s28 + $0x28] sm:$0xff]  ;;  %s1873_s23 = scalar_lea.vmem %s2370_s29, 1024  ;;  %s1960_s10 = smov [#allocation11]  }
  0xbe   : > { %1608 = vmatprep.subr.bf16.mxu1 %v1603_v3  ;;  %1606 = vmatpush3.bf16.msra.mxu0 %v1603_v3  ;;  %v342_v10 = vld [vmem:[%s2254_s3 + $0x18] sm:$0xff]  ;;  %v343_v12 = vld [vmem:[%s2254_s3 + $0x20] sm:$0xff]  ;;  %v344_v14 = vld [vmem:[%s2254_s3 + $0x28] sm:$0xff]  ;;  %p1874_p2 = scmp.ne.s32.totalorder %s2370_s29, %s1873_s23  ;;  %s1877_s2 = sshll.u32 %s1960_s10, 4  ;;  %s1878_s2 = int_to_ptr.vmem [resolvable:$false] %s1877_s2 }
  0xbf   : > { %1610 = vmatpush3.bf16.msra.mxu1 %v1603_v3  ;;  %v2308_v15 = vld [vmem:[%s2246_s28 + $0x30] sm:$0xff]  ;;  %v2317_v17 = vld [vmem:[%s2246_s28 + $0x38] sm:$0xff]  ;;  %v347_v19 = vld [vmem:[#allocation7] sm:$0xff]  ;;  %s1879_s8 = scalar_lea.vmem %s1878_s2, 2048  ;;  %p1880_p8 = scmp.lt.s32.totalorder %s2370_s29, %s1878_s2 }
  0xc0   : > { %v345_v16 = vld [vmem:[%s2254_s3 + $0x30] sm:$0xff]  ;;  %v346_v18 = vld [vmem:[%s2254_s3 + $0x38] sm:$0xff]  ;;  %v348_v30 = vld [vmem:[#allocation7 + $0x8] sm:$0xff]  ;;  %p1875_p4 = pnand %p1874_p2, %p2147_p5  ;;  %p1881_p6 = scmp.lt.s32.totalorder %s1879_s8, %s1873_s23 }
  0xc1   : > { %1520 = vmatmul.mubr.msk.f32.vlgmr.msra.gmra.mrb[0].mxu0 %vm353_vm0, %v2276_v5  ;;  %v352_v49 = vld [vmem:[#allocation10 + $0x8] sm:$0xff]  ;;  %v351_v52 = vld [vmem:[#allocation10] sm:$0xff] }
  0xc2   : > { %1536 = vmatmul.mubr.msk.f32.vlgmr.msra.gmra.mrb[0].mxu1 %vm353_vm0, %v340_v6  ;;  %1522 = vmatprep.mubr.msk.f32.mxu0 %vm353_vm0, %v2280_v7  ;;  %p1876_p0 = pneg %p1875_p4  ;;  %p1882_p10 = por %p1881_p6, %p1880_p8 }
  0xc3   : > { %1538 = vmatprep.mubr.msk.f32.mxu1 %vm353_vm0, %v341_v8 }
  0xc4   : > { %p1883_p3 = pnand %p1882_p10, %p1876_p0 }
  0xc5   : > { %1523 = vmatmul.mubr.msk.f32.gmra.mrb[2].mxu0 %vm353_vm0, %v2289_v9 }
  0xc6   : > { %1539 = vmatmul.mubr.msk.f32.gmra.mrb[2].mxu1 %vm353_vm0, %v342_v10  ;;  %1525 = vmatprep.mubr.msk.f32.mxu0 %vm353_vm0, %v2294_v11 }
  0xc7   : > { %1541 = vmatprep.mubr.msk.f32.mxu1 %vm353_vm0, %v343_v12 }
  0xc9   : > { %1526 = vmatmul.mubr.msk.f32.gmra.mrb[4].mxu0 %vm353_vm0, %v2303_v13 }
  0xca   : > { %1542 = vmatmul.mubr.msk.f32.gmra.mrb[4].mxu1 %vm353_vm0, %v344_v14  ;;  %1528 = vmatprep.mubr.msk.f32.mxu0 %vm353_vm0, %v2308_v15 }
  0xcb   : > { %1544 = vmatprep.mubr.msk.f32.mxu1 %vm353_vm0, %v345_v16 }
  0xcd   : > { %1529 = vmatmul.mubr.msk.f32.gmra.mrb[6].mxu0 %vm353_vm0, %v2317_v17 }
  0xce   : > { %1545 = vmatmul.mubr.msk.f32.gmra.mrb[6].mxu1 %vm353_vm0, %v346_v18  ;;  %1551 = vmatprep.mubr.msk.f32.mxu0 %vm353_vm0, %v347_v19 }
  0xcf   : > { %1558 = vmatprep.mubr.msk.f32.mxu1 %vm353_vm0, %v347_v19 }
 0x194   : > { %v1521_v20 = vpop.f32.mrb[0].mxu0 }
 0x195   : > { %v1537_v21 = vpop.f32.mrb[0].mxu1  ;;  %v444_v22 = vpop.f32.mrb[1].mxu0 }
 0x196   : > { %v573_v23 = vpop.f32.mrb[1].mxu1  ;;  %v1611_v24 = vpack.c.bf16 %v1521_v20, %v444_v22 }
 0x197   : > { %v1615_v25 = vpack.c.bf16 %v1537_v21, %v573_v23 }
 0x198   : > { %1612 = vmatprep.subr.bf16.mxu0 %v1611_v24  ;;  %v1524_v26 = vpop.f32.mrb[2].mxu0 }
 0x199   : > { %1616 = vmatprep.subr.bf16.mxu1 %v1615_v25  ;;  %v1540_v27 = vpop.f32.mrb[2].mxu1  ;;  %1614 = vmatpush3.bf16.msra.mxu0 %v1611_v24  ;;  %v454_v28 = vpop.f32.mrb[3].mxu0 }
 0x19a   : > { %1618 = vmatpush3.bf16.msra.mxu1 %v1615_v25  ;;  %v583_v29 = vpop.f32.mrb[3].mxu1  ;;  %v1619_v31 = vpack.c.bf16 %v1524_v26, %v454_v28 }
 0x19b   : > { %v1623_v32 = vpack.c.bf16 %v1540_v27, %v583_v29 }
 0x19c   : > { %v1527_v33 = vpop.f32.mrb[4].mxu0  ;;  %1620 = vmatprep.subr.bf16.mxu0 %v1619_v31  ;;  %1552 = vmatmul.mubr.msk.f32.vlgmr.msra.gmra.mrb[8].mxu0 %vm353_vm0, %v348_v30 }
 0x19d   : > { %v1543_v34 = vpop.f32.mrb[4].mxu1  ;;  %v464_v35 = vpop.f32.mrb[5].mxu0  ;;  %1622 = vmatpush3.bf16.msra.mxu0 %v1619_v31  ;;  %1624 = vmatprep.subr.bf16.mxu1 %v1623_v32 }
 0x19e   : > { %v593_v36 = vpop.f32.mrb[5].mxu1  ;;  %v1627_v37 = vpack.c.bf16 %v1527_v33, %v464_v35  ;;  %1559 = vmatmul.mubr.msk.f32.vlgmr.msra.gmra.mrb[8].mxu1 %vm353_vm0, %v348_v30  ;;  %1565 = vmatprep.mubr.msk.f32.mxu0 %vm353_vm0, %v347_v19 }
 0x19f   : > { %v1631_v38 = vpack.c.bf16 %v1543_v34, %v593_v36  ;;  %1626 = vmatpush3.bf16.msra.mxu1 %v1623_v32  ;;  %1572 = vmatprep.mubr.msk.f32.mxu1 %vm353_vm0, %v347_v19 }
 0x1a0   : > { %v1530_v39 = vpop.f32.mrb[6].mxu0  ;;  %1628 = vmatprep.subr.bf16.mxu0 %v1627_v37  ;;  %1566 = vmatmul.mubr.msk.f32.vlgmr.msra.gmra.mrb[10].mxu0 %vm353_vm0, %v348_v30 }
 0x1a1   : > { %v1546_v40 = vpop.f32.mrb[6].mxu1  ;;  %v474_v41 = vpop.f32.mrb[7].mxu0  ;;  %1630 = vmatpush3.bf16.msra.mxu0 %v1627_v37  ;;  %1632 = vmatprep.subr.bf16.mxu1 %v1631_v38 }
 0x1a2   : > { %v603_v42 = vpop.f32.mrb[7].mxu1  ;;  %v1635_v43 = vpack.c.bf16 %v1530_v39, %v474_v41  ;;  %1573 = vmatmul.mubr.msk.f32.vlgmr.msra.gmra.mrb[10].mxu1 %vm353_vm0, %v348_v30  ;;  %1579 = vmatprep.mubr.msk.f32.mxu0 %vm353_vm0, %v347_v19 }
 0x1a3   : > { %v1639_v44 = vpack.c.bf16 %v1546_v40, %v603_v42  ;;  %1634 = vmatpush3.bf16.msra.mxu1 %v1631_v38  ;;  %1586 = vmatprep.mubr.msk.f32.mxu1 %vm353_vm0, %v347_v19 }
 0x1a4   : > { %1636 = vmatprep.subr.bf16.mxu0 %v1635_v43  ;;  %1580 = vmatmul.mubr.msk.f32.vlgmr.msra.gmra.mrb[12].mxu0 %vm353_vm0, %v348_v30 }
 0x1a5   : > { %1638 = vmatpush3.bf16.msra.mxu0 %v1635_v43  ;;  %1640 = vmatprep.subr.bf16.mxu1 %v1639_v44 }
 0x1a6   : > { %1587 = vmatmul.mubr.msk.f32.vlgmr.msra.gmra.mrb[12].mxu1 %vm353_vm0, %v348_v30  ;;  %1593 = vmatprep.mubr.msk.f32.mxu0 %vm353_vm0, %v347_v19 }
 0x1a7   : > { %1642 = vmatpush3.bf16.msra.mxu1 %v1639_v44  ;;  %1600 = vmatprep.mubr.msk.f32.mxu1 %vm353_vm0, %v347_v19 }
 0x1a8   : > { %1594 = vmatmul.mubr.msk.f32.vlgmr.msra.gmra.mrb[14].mxu0 %vm353_vm0, %v348_v30 }
 0x1aa   : > { %1601 = vmatmul.mubr.msk.f32.vlgmr.msra.gmra.mrb[14].mxu1 %vm353_vm0, %v348_v30 }
 0x26f   : > { %v1553_v45 = vpop.f32.mrb[8].mxu0 }
 0x270   : > { %v769_v46 = vmul.f32 %v1553_v45, %v2276_v5  ;;  %v684_v47 = vpop.f32.mrb[9].mxu0 }
 0x271   : > { %v768_v48 = vmul.f32 %v684_v47, %v2269_v2  ;;  %v1560_v50 = vpop.f32.mrb[8].mxu1 }
 0x272   : > { %v771_v51 = vadd.f32 %v1560_v50, %v769_v46  ;;  %v759_v53 = vpop.f32.mrb[9].mxu1 }
 0x273   : > { %v770_v54 = vadd.f32 %v768_v48, %v759_v53  ;;  %v1567_v55 = vpop.f32.mrb[10].mxu0 }
 0x274   : > { %v773_v56 = vmul.f32 %v771_v51, %v352_v49  ;;  %v927_v57 = vmul.f32 %v1567_v55, %v2289_v9  ;;  %v842_v58 = vpop.f32.mrb[11].mxu0 }
 0x275   : > { %v772_v59 = vmul.f32 %v770_v54, %v351_v52  ;;  %v926_v60 = vmul.f32 %v842_v58, %v2280_v7  ;;  %v1574_v61 = vpop.f32.mrb[10].mxu1 }
 0x276   : > { %775 = vst.msk [vmem:[%s2345_s24 + $0x8] sm:$0xff] %vm353_vm0, %v773_v56  ;;  %v929_v62 = vadd.f32 %v1574_v61, %v927_v57  ;;  %v917_v63 = vpop.f32.mrb[11].mxu1 }
 0x277   : > { %774 = vst.msk [vmem:[%s2345_s24] sm:$0xff] %vm353_vm0, %v772_v59  ;;  %v928_v0 = vadd.f32 %v926_v60, %v917_v63  ;;  %v1581_v1 = vpop.f32.mrb[12].mxu0 }
 0x278   : > { %v931_v2 = vmul.f32 %v929_v62, %v352_v49  ;;  %v1086_v3 = vmul.f32 %v1581_v1, %v2303_v13  ;;  %v1001_v4 = vpop.f32.mrb[13].mxu0 }
 0x279   : > { %v930_v5 = vmul.f32 %v928_v0, %v351_v52  ;;  %v1085_v6 = vmul.f32 %v1001_v4, %v2294_v11  ;;  %v1588_v7 = vpop.f32.mrb[12].mxu1 }
 0x27a   : > { %1438 = vst.msk [vmem:[%s2345_s24 + $0x18] sm:$0xff] %vm353_vm0, %v931_v2  ;;  %v1088_v8 = vadd.f32 %v1588_v7, %v1086_v3  ;;  %v1076_v9 = vpop.f32.mrb[13].mxu1 }
 0x27b   : > { %1437 = vst.msk [vmem:[%s2345_s24 + $0x10] sm:$0xff] %vm353_vm0, %v930_v5  ;;  %v1087_v10 = vadd.f32 %v1085_v6, %v1076_v9  ;;  %v1595_v12 = vpop.f32.mrb[14].mxu0 }
 0x27c   : > { %v1090_v14 = vmul.f32 %v1088_v8, %v352_v49  ;;  %v1245_v13 = vmul.f32 %v1595_v12, %v2317_v17  ;;  %v1160_v16 = vpop.f32.mrb[15].mxu0 }
 0x27d   : > { %v1089_v18 = vmul.f32 %v1087_v10, %v351_v52  ;;  %v1244_v11 = vmul.f32 %v1160_v16, %v2308_v15  ;;  %v1602_v19 = vpop.f32.mrb[14].mxu1 }
 0x27e   : > { %1444 = vst.msk [vmem:[%s2345_s24 + $0x28] sm:$0xff] %vm353_vm0, %v1090_v14  ;;  %v1247_v20 = vadd.f32 %v1602_v19, %v1245_v13  ;;  %v1235_v21 = vpop.f32.mrb[15].mxu1 }
 0x27f   : > { %1443 = vst.msk [vmem:[%s2345_s24 + $0x20] sm:$0xff] %vm353_vm0, %v1089_v18  ;;  %v1246_v22 = vadd.f32 %v1244_v11, %v1235_v21 }
 0x280   : > { %v1249_v23 = vmul.f32 %v1247_v20, %v352_v49 }
 0x281   : > { %v1248_v15 = vmul.f32 %v1246_v22, %v351_v52 }
 0x282   : > { %1450 = vst.msk [vmem:[%s2345_s24 + $0x38] sm:$0xff] %vm353_vm0, %v1249_v23 }
 0x283   : > { %1449 = vst.msk [vmem:[%s2345_s24 + $0x30] sm:$0xff] %vm353_vm0, %v1248_v15 }
 0x284   : > { %1886 = shalt.err (!%p1883_p3)
}
 0x285   : > { %s1887_s13 = scalar_lea.hbm %s2368_s9, 1024  ;;  %s1891_s11 = scalar_lea.hbm %s2423_s5, 2048 }
 0x286   : > { %p1888_p9 = scmp.ne.s32.totalorder %s2368_s9, %s1887_s13  ;;  %p1892_p7 = scmp.lt.u32.totalorder %s2368_s9, %s2423_s5 }
 0x287   : > { %p1893_p12 = scmp.lt.u32.totalorder %s1891_s11, %s1887_s13  ;;  %p1895_p2 = scmp.lt.u32.totalorder %s1887_s13, %s2368_s9 }
 0x288   : > { %p1889_p13 = pnand %p1888_p9, %p2147_p5 }
 0x289   : > { %p1894_p1 = por %p1893_p12, %p1892_p7 }
 0x28a   : > { %p1890_p11 = pneg %p1889_p13 }
 0x28b   : > { %p1896_p4 = por %p1895_p2, %p1894_p1 }
 0x28d   : > { %p1897_p0 = pnand %p1896_p4, %p1890_p11 }
 0x28f   : > { %1900 = shalt.err (!%p1897_p0)
}
 0x290   : > { %s1961_s26 = smov 128   ;;  %s1962_s17 = smov 8  }
 0x291   : > { %1659 = dma.vmem_to_hbm [thread:$0]  (%p2147_p5), %s2370_s29, 1024, %s2368_s9, %s1254_s22, %s1961_s26, %s1961_s26, %s1962_s17  }
 0x292 PF: > { %s1283_s3 = sand.u32 1, %s1939_s18   ;;  %p2455_p8 = scmp.ne.s32.totalorder %s2436_s25, 0 }
 0x293   : > { %p2456_p6 = scmp.ge.s32.totalorder %s1951_s21, 2  ;;  %s1284_s24 = scalar_lea.sflag [#allocation4], %s1283_s3 }
 0x295   : > { %p1679_p10 = pnand %p2456_p6, %p2455_p8 }
 0x297   : > { %1934 = dma.done.wait (!%p1679_p10), %s1284_s24, 1024  }
 0x298   : > { %1936 = vsyncadd (!%p1679_p10), %s1284_s24, 4294966272  ;;  %p22_p3 = scmp.ge.s32.totalorder %s2133_s14, 4   ;;  %s2457_s18 = smov %s1943_s19 }
 0x299   : > { %s2458_s19 = smov %s1947_s20  ;;  %s2459_s20 = smov %s2143_s30 }
 0x29a   : > { %s2460_s21 = smov %s2133_s14  ;;  %24 = sbr.rel (!%p22_p3) target bundleno = 13 (0xd), region = 113 }
 0x2a1   :  { %1289 = vsyncpa [#allocation3], 1 }
 0x2a2   :  { %1291 = vsyncpa [#allocation3 + $0x1], 1 }
 0x2a3   :  { %1292 = vsyncpa [#allocation6], 1 }
 0x2a4   :  { %1294 = vsyncpa [#allocation6 + $0x1], 1 }
 0x2a5   :  { %1295 = vsyncpa [#allocation9], 1 }
 0x2a6   :  { %1296 = vsyncpa [#allocation4], 1 }
 0x2a7   :  { %1298 = vsyncpa [#allocation4 + $0x1], 1 }

</bundles_post_ra>
